<compile_context>
chip_gen: v7x
topology: tpu7x:2x2x1
jax: 0.10.0
libtpu: 0.0.40
codegen_flags: <defaults>
</compile_context>

<pallas_src>
import jax
import jax.numpy as jnp
from jax.experimental import pallas as pl
from jax.experimental.pallas import tpu as pltpu


_LANE = 128
_SUBLANE = 8
# Working-set target for the double-buffered pipeline.  Conservative enough
# for v7x (64 MiB physical VMEM); v5e/v6e (128 MiB) have ample headroom.
_VMEM_BUDGET = 28 * 1024 * 1024


# ----------------------------------------------------------------------------
# Tile selection
# ----------------------------------------------------------------------------
def _largest_aligned_divisor(dim, cap, align):
    """Largest t <= cap with dim % t == 0 and t % align == 0 (else full dim)."""
    if dim <= cap:
        return dim
    t = (cap // align) * align
    while t >= align:
        if dim % t == 0:
            return t
        t -= align
    return dim  # no aligned divisor below cap -> single block on this axis


def _shrink(t, dim, align):
    cand = _largest_aligned_divisor(dim, max(t // 2, align), align)
    return cand if cand < t else t


def _tile_sizes(M, N, K, *, with_label, with_output):
    """Shape-adaptive tiles: as large as possible (full dims for the demo
    shapes -> grid (1,1)), shrunk only if the double-buffered working set
    would exceed the VMEM budget."""
    tm = _largest_aligned_divisor(M, 512, _SUBLANE)
    tn = _largest_aligned_divisor(N, 512, _LANE)
    tk = _largest_aligned_divisor(K, 1024, _LANE)

    def vmem_bytes(tm_, tn_, tk_):
        nk = K // tk_
        b = 2 * tm_ * tk_ * 2            # x   (bf16, double-buffered)
        b += 2 * tk_ * tn_ * 2           # w   (bf16, double-buffered)
        b += 2 * tn_ * 4                 # bias (f32)
        if with_label:
            b += 2 * tm_ * tn_ * 2       # label (bf16)
            b += 2 * _SUBLANE * _LANE * 4  # partial-loss block
        if with_output:
            b += 2 * tm_ * tn_ * 4       # output (f32)
        if nk > 1:
            b += tm_ * tn_ * 4           # f32 K-accumulator scratch
        return b

    while vmem_bytes(tm, tn, tk) > _VMEM_BUDGET:
        new_tk = _shrink(tk, K, _LANE)
        if new_tk != tk:
            tk = new_tk
            continue
        new_tm = _shrink(tm, M, _SUBLANE)
        if new_tm != tm:
            tm = new_tm
            continue
        new_tn = _shrink(tn, N, _LANE)
        if new_tn != tn:
            tn = new_tn
            continue
        break  # cannot shrink further; rely on the scoped-VMEM headroom

    return tm, tn, tk, vmem_bytes(tm, tn, tk)


def _vmem_limit(est_bytes):
    return int(min(96 * 1024 * 1024, max(32 * 1024 * 1024, 2 * est_bytes)))


def _grid_and_specs(M, N, K, tm, tn, tk, *, with_label):
    gm, gn, gk = M // tm, N // tn, K // tk
    multi_k = gk > 1
    if multi_k:
        grid = (gm, gn, gk)
        dims = ("parallel", "parallel", "arbitrary")
        x_map = lambda i, j, k: (i, k)
        w_map = lambda i, j, k: (k, j)
        b_map = lambda i, j, k: (0, j)
        o_map = lambda i, j, k: (i, j)
    else:
        grid = (gm, gn)
        dims = ("parallel", "parallel")
        x_map = lambda i, j: (i, 0)
        w_map = lambda i, j: (0, j)
        b_map = lambda i, j: (0, j)
        o_map = lambda i, j: (i, j)

    in_specs = [
        pl.BlockSpec((tm, tk), x_map),
        pl.BlockSpec((tk, tn), w_map),
        pl.BlockSpec((1, tn), b_map),
    ]
    if with_label:
        # TODO(synk): label/bias blocks could use pipeline_mode=pl.Buffered(1)
        #             to trim peak VMEM when tiles are enlarged further.
        in_specs.append(pl.BlockSpec((tm, tn), o_map))
    return grid, gm, gn, gk, multi_k, dims, in_specs, o_map


# ----------------------------------------------------------------------------
# Kernels
# ----------------------------------------------------------------------------
def _fwd_single_k(x_ref, w_ref, b_ref, o_ref):
    """o = relu(x @ W + b), K fits a single tile: no scratch, no phases."""
    acc = jnp.dot(x_ref[...], w_ref[...], preferred_element_type=jnp.float32)
    o_ref[...] = jnp.maximum(acc + b_ref[...].astype(jnp.float32),
                             0.0).astype(o_ref.dtype)


def _fwd_multi_k(x_ref, w_ref, b_ref, o_ref, acc_ref):
    """Gridded o = relu(x @ W + b); acc_ref is the resident f32 K-accumulator."""
    k = pl.program_id(2)

    @pl.when(k == 0)
    def _():
        acc_ref[...] = jnp.zeros_like(acc_ref)

    acc_ref[...] += jnp.dot(x_ref[...], w_ref[...],
                            preferred_element_type=jnp.float32)

    @pl.when(k == pl.num_programs(2) - 1)
    def _():
        o_ref[...] = jnp.maximum(acc_ref[...] + b_ref[...].astype(jnp.float32),
                                 0.0).astype(o_ref.dtype)


def _train_epilogue(out_f32, y_ref, o_ref, lpart_ref, write_output):
    if write_output:
        o_ref[...] = out_f32.astype(o_ref.dtype)
    d = out_f32 - y_ref[...].astype(jnp.float32)
    # lane reduce then sublane reduce -> (1,1) partial SSE for this tile,
    # broadcast to its private (8,128) block (full-lane, unmasked store).
    part = jnp.sum(jnp.sum(d * d, axis=1, keepdims=True), axis=0, keepdims=True)
    lpart_ref[...] = jnp.broadcast_to(part, lpart_ref.shape)


def _make_train_kernel(multi_k, write_output):
    def body(x_ref, w_ref, b_ref, y_ref, o_ref, lpart_ref, acc_ref):
        if multi_k:
            k = pl.program_id(2)

            @pl.when(k == 0)
            def _():
                acc_ref[...] = jnp.zeros_like(acc_ref)

            acc_ref[...] += jnp.dot(x_ref[...], w_ref[...],
                                    preferred_element_type=jnp.float32)

            @pl.when(k == pl.num_programs(2) - 1)
            def _():
                out = jnp.maximum(
                    acc_ref[...] + b_ref[...].astype(jnp.float32), 0.0)
                _train_epilogue(out, y_ref, o_ref, lpart_ref, write_output)
        else:
            acc = jnp.dot(x_ref[...], w_ref[...],
                          preferred_element_type=jnp.float32)
            out = jnp.maximum(acc + b_ref[...].astype(jnp.float32), 0.0)
            _train_epilogue(out, y_ref, o_ref, lpart_ref, write_output)

    if multi_k and write_output:
        def kernel(x_ref, w_ref, b_ref, y_ref, o_ref, lpart_ref, acc_ref):
            body(x_ref, w_ref, b_ref, y_ref, o_ref, lpart_ref, acc_ref)
    elif multi_k:
        def kernel(x_ref, w_ref, b_ref, y_ref, lpart_ref, acc_ref):
            body(x_ref, w_ref, b_ref, y_ref, None, lpart_ref, acc_ref)
    elif write_output:
        def kernel(x_ref, w_ref, b_ref, y_ref, o_ref, lpart_ref):
            body(x_ref, w_ref, b_ref, y_ref, o_ref, lpart_ref, None)
    else:
        def kernel(x_ref, w_ref, b_ref, y_ref, lpart_ref):
            body(x_ref, w_ref, b_ref, y_ref, None, lpart_ref, None)
    return kernel


# ----------------------------------------------------------------------------
# Wrappers calling pallas_call
# ----------------------------------------------------------------------------
def pallas_forward(x, w, b):
    M, K = x.shape
    K2, N = w.shape
    assert K == K2
    tm, tn, tk, est = _tile_sizes(M, N, K, with_label=False, with_output=True)
    # TODO(synk): add zero-pad + mask handling for shapes with no clean tiling.
    assert M % tm == 0 and N % tn == 0 and K % tk == 0

    x = x.astype(jnp.bfloat16)           # bf16 MXU inputs, f32 accumulation
    w = w.astype(jnp.bfloat16)
    b = b.astype(jnp.float32).reshape(1, N)

    grid, gm, gn, gk, multi_k, dims, in_specs, o_map = _grid_and_specs(
        M, N, K, tm, tn, tk, with_label=False)

    kernel = _fwd_multi_k if multi_k else _fwd_single_k
    scratch = [pltpu.VMEM((tm, tn), jnp.float32)] if multi_k else []

    return pl.pallas_call(
        kernel,
        out_shape=jax.ShapeDtypeStruct((M, N), jnp.float32),
        grid_spec=pltpu.PrefetchScalarGridSpec(
            num_scalar_prefetch=0,
            grid=grid,
            in_specs=in_specs,
            out_specs=pl.BlockSpec((tm, tn), o_map),
            scratch_shapes=scratch,
        ),
        compiler_params=pltpu.CompilerParams(
            dimension_semantics=dims,
            vmem_limit_bytes=_vmem_limit(est),
        ),
        cost_estimate=pl.CostEstimate(
            flops=2 * M * N * K,
            transcendentals=0,
            bytes_accessed=(M * K * 2 * gn + K * N * 2 * gm
                            + gm * N * 4 + M * N * 4),
        ),
    )(x, w, b)


def pallas_train(x, w, b, label, *, with_output=True):
    M, K = x.shape
    K2, N = w.shape
    assert K == K2
    tm, tn, tk, est = _tile_sizes(M, N, K, with_label=True,
                                  with_output=with_output)
    assert M % tm == 0 and N % tn == 0 and K % tk == 0

    x = x.astype(jnp.bfloat16)
    w = w.astype(jnp.bfloat16)
    b = b.astype(jnp.float32).reshape(1, N)
    # bf16 labels halve the label HBM read; widened to f32 inside the kernel.
    label = label.astype(jnp.bfloat16)

    grid, gm, gn, gk, multi_k, dims, in_specs, o_map = _grid_and_specs(
        M, N, K, tm, tn, tk, with_label=True)

    # Per-(i,j) partial squared-error sums: each tile owns one (8,128)-aligned
    # block, so the i/j axes stay "parallel" (megacore-safe) and the final
    # mean is a trivial wrapper-side reduction.
    lpart_shape = jax.ShapeDtypeStruct((gm * _SUBLANE, gn * _LANE), jnp.float32)
    lpart_spec = pl.BlockSpec((_SUBLANE, _LANE), o_map)

    if with_output:
        out_shape = (jax.ShapeDtypeStruct((M, N), jnp.float32), lpart_shape)
        out_specs = (pl.BlockSpec((tm, tn), o_map), lpart_spec)
        out_bytes = M * N * 4
    else:
        out_shape = lpart_shape
        out_specs = lpart_spec
        out_bytes = 0            # loss-only: no [batch, out] writeback

    kernel = _make_train_kernel(multi_k, with_output)
    scratch = [pltpu.VMEM((tm, tn), jnp.float32)] if multi_k else []

    result = pl.pallas_call(
        kernel,
        out_shape=out_shape,
        grid_spec=pltpu.PrefetchScalarGridSpec(
            num_scalar_prefetch=0,
            grid=grid,
            in_specs=in_specs,
            out_specs=out_specs,
            scratch_shapes=scratch,
        ),
        compiler_params=pltpu.CompilerParams(
            dimension_semantics=dims,
            vmem_limit_bytes=_vmem_limit(est),
        ),
        cost_estimate=pl.CostEstimate(
            flops=2 * M * N * K + 4 * M * N,
            transcendentals=0,
            bytes_accessed=(M * K * 2 * gn + K * N * 2 * gm + gm * N * 4
                            + M * N * 2 + out_bytes
                            + gm * gn * _SUBLANE * _LANE * 4),
        ),
    )(x, w, b, label)

    if with_output:
        out, lpart = result
    else:
        out, lpart = None, result

    # Element [0,0] of each (8,128) block holds that tile's partial SSE.
    loss = jnp.sum(lpart[::_SUBLANE, ::_LANE]) / (M * N)

    if with_output:
        return out, loss
    return loss


# ----------------------------------------------------------------------------
# ModelWrapper equivalent
# ----------------------------------------------------------------------------
class ModelWrapper:
    """JAX/Pallas mirror of the PyTorch ModelWrapper (Linear+ReLU model, MSE loss)."""

    def __init__(self, w, b):
        self.w = w
        self.b = b

    def forward(self, x):
        return pallas_forward(x, self.w, self.b)

    def loss_op(self, x, label):
        # loss-only kernel: skips the [batch, out] HBM writeback entirely.
        return pallas_train(x, self.w, self.b, label, with_output=False)

    def train_op(self, x, label):
        return pallas_train(x, self.w, self.b, label, with_output=True)

    def __call__(self, x, label=None):
        if label is None:
            return self.forward(x)
        return self.train_op(x, label)


# ----------------------------------------------------------------------------
# Main
# ----------------------------------------------------------------------------
if __name__ == "__main__":
    # Lane-dense, tile-aligned shapes; with the adaptive tiles the whole
    # problem is a single (1,1) grid step (no K accumulator, no pl.when).
    batch, hidden, out_dim = 128, 256, 256

    key = jax.random.PRNGKey(0)
    kx, kw, kb, ky = jax.random.split(key, 4)

    x = jax.random.normal(kx, (batch, hidden), dtype=jnp.float32)
    w = jax.random.normal(kw, (hidden, out_dim), dtype=jnp.float32) * 0.1
    b = jax.random.normal(kb, (1, out_dim), dtype=jnp.float32) * 0.1
    label = jax.random.normal(ky, (batch, out_dim), dtype=jnp.float32)

    wrapper = ModelWrapper(w, b)

    # inference path: wrapper(x)
    y_infer = wrapper(x)
    jax.block_until_ready(y_infer)

    # training path: wrapper(x, label) -> (output, loss)
    y_train, loss = wrapper(x, label)
    jax.block_until_ready((y_train, loss))

    # loss-only path
    loss_only = wrapper.loss_op(x, label)
    jax.block_until_ready(loss_only)

    # reference in plain JAX, using the same bf16-rounded matmul inputs/labels
    xb = x.astype(jnp.bfloat16).astype(jnp.float32)
    wb = w.astype(jnp.bfloat16).astype(jnp.float32)
    lb = label.astype(jnp.bfloat16).astype(jnp.float32)
    ref_out = jnp.maximum(xb @ wb + b, 0.0)
    ref_loss = jnp.mean((ref_out - lb) ** 2)

    assert jnp.allclose(y_infer, ref_out, atol=1e-3, rtol=1e-3)
    assert jnp.allclose(y_train, ref_out, atol=1e-3, rtol=1e-3)
    assert jnp.allclose(loss, ref_loss, atol=1e-3, rtol=1e-3)
    assert jnp.allclose(loss_only, ref_loss, atol=1e-3, rtol=1e-3)

    print("KERNEL_OK")
</pallas_src>

<mosaic_0001>
module attributes {stable_mosaic.version = 11 : i64} {
  func.func @_fwd_single_k(%arg0: i32, %arg1: i32, %arg2: memref<128x256xbf16, #tpu.memory_space<vmem>>, %arg3: memref<256x256xbf16, #tpu.memory_space<vmem>>, %arg4: memref<1x256xf32, #tpu.memory_space<vmem>>, %arg5: memref<128x256xf32, #tpu.memory_space<vmem>>) attributes {dimension_semantics = [#tpu.dimension_semantics<parallel>, #tpu.dimension_semantics<parallel>], iteration_bounds = array<i64: 1, 1>, scalar_prefetch = 0 : i64, scratch_operands = 0 : i64, tpu.core_type = #tpu.core_type<tc>, window_params = [{transform_indices = @transform_0, window_bounds = array<i64: 128, 256>}, {transform_indices = @transform_1, window_bounds = array<i64: 256, 256>}, {transform_indices = @transform_2, window_bounds = array<i64: 1, 256>}, {transform_indices = @transform_3, window_bounds = array<i64: 128, 256>}]} {
    %c0 = arith.constant 0 : index
    %c0_0 = arith.constant 0 : index
    %0 = vector.load %arg2[%c0, %c0_0] : memref<128x256xbf16, #tpu.memory_space<vmem>>, vector<128x256xbf16>
    %c0_1 = arith.constant 0 : index
    %c0_2 = arith.constant 0 : index
    %1 = vector.load %arg3[%c0_1, %c0_2] : memref<256x256xbf16, #tpu.memory_space<vmem>>, vector<256x256xbf16>
    %cst = arith.constant dense<0.000000e+00> : vector<128x256xf32>
    %2 = tpu.matmul %0, %1, %cst {dimension_numbers = #tpu.dot_dimension_numbers<[1], [0], [0], [1], [0, 0, 1, 1], [], []>} : vector<128x256xbf16>, vector<256x256xbf16>, vector<128x256xf32> -> vector<128x256xf32>
    %c0_3 = arith.constant 0 : index
    %c0_4 = arith.constant 0 : index
    %3 = vector.load %arg4[%c0_3, %c0_4] : memref<1x256xf32, #tpu.memory_space<vmem>>, vector<1x256xf32>
    %4 = vector.broadcast %3 : vector<1x256xf32> to vector<128x256xf32>
    %5 = arith.addf %2, %4 : vector<128x256xf32>
    %cst_5 = arith.constant 0.000000e+00 : f32
    %6 = vector.broadcast %cst_5 : f32 to vector<128x256xf32>
    %7 = arith.maximumf %5, %6 : vector<128x256xf32>
    %c0_6 = arith.constant 0 : index
    %c0_7 = arith.constant 0 : index
    %8 = vector.load %arg5[%c0_6, %c0_7] : memref<128x256xf32, #tpu.memory_space<vmem>>, vector<128x256xf32>
    tpu.vector_store %arg5[%c0_6, %c0_7], %7 {strides = array<i32>} : memref<128x256xf32, #tpu.memory_space<vmem>>, vector<128x256xf32>,
    return
  }
  func.func @transform_0(%arg0: i32, %arg1: i32) -> (i32, i32) {
    %c0_i32 = arith.constant 0 : i32
    %c0_i32_0 = arith.constant 0 : i32
    return %arg0, %c0_i32 : i32, i32
  }
  func.func @transform_1(%arg0: i32, %arg1: i32) -> (i32, i32) {
    %c0_i32 = arith.constant 0 : i32
    %c0_i32_0 = arith.constant 0 : i32
    return %c0_i32, %arg1 : i32, i32
  }
  func.func @transform_2(%arg0: i32, %arg1: i32) -> (i32, i32) {
    %c0_i32 = arith.constant 0 : i32
    %c0_i32_0 = arith.constant 0 : i32
    return %c0_i32, %arg1 : i32, i32
  }
  func.func @transform_3(%arg0: i32, %arg1: i32) -> (i32, i32) {
    %c0_i32 = arith.constant 0 : i32
    return %arg0, %arg1 : i32, i32
  }
}

</mosaic_0001>

<bundles_post_ra>
// kernel: tpu_custom_call.1
= control target key start
LH: loop header
LB: loop body
LE: loop exit
PB: predicated region body
PF: predicated region fallthrough
CT: control target
= control target key end

     0   :  { %8 = vsyncpa [#allocation3], 0  ;;  %s871_s0 = inlined_call_operand.hbm [shape: bf16[128,256], index: 0, kind: input, shape index: {}]   ;;  %s872_s1 = inlined_call_operand.hbm [shape: bf16[256,256], index: 1, kind: input, shape index: {}]   ;;  %s873_s2 = inlined_call_operand.vmem [shape: f32[1,256], index: 2, kind: input, shape index: {}]   ;;  %s874_s3 = inlined_call_operand.hbm [shape: f32[128,256], index: 3, kind: output, shape index: {}]  }
   0x1   :  { %9 = vsyncpa [#allocation6], 0 }
   0x2   :  { %10 = vsyncpa [#allocation4], 0  ;;  %s769_s12 = smov [#allocation2]   ;;  %s697_s16 = scalar_lea.hbm %s871_s0, 2048 }
   0x3   :  { %s16_s13 = sshll.u32 %s769_s12, 4  ;;  %p698_p0 = scmp.ne.s32.totalorder %s871_s0, %s697_s16  ;;  %s17_s13 = int_to_ptr.vmem [resolvable:$true] %s16_s13 }
   0x4   :  { %p701_p1 = scmp.lt.u32.totalorder %s697_s16, %s871_s0 }
   0x6   :  { %p703_p2 = pnand %p701_p1, %p698_p0 }
   0x8   :  { %706 = shalt.err (!%p703_p2)
}
   0x9   :  { %s707_s21 = scalar_lea.vmem %s17_s13, 2048  ;;  %p712_p4 = scmp.lt.s32.totalorder %s17_s13, %s17_s13 }
   0xa   :  { %p708_p3 = scmp.ne.s32.totalorder %s17_s13, %s707_s21  ;;  %p713_p5 = scmp.lt.s32.totalorder %s707_s21, %s707_s21 }
   0xc   :  { %p714_p6 = por %p713_p5, %p712_p4 }
   0xe   :  { %p715_p7 = pnand %p714_p6, %p708_p3 }
  0x10   :  { %718 = shalt.err (!%p715_p7)
}
  0x11   :  { %s770_s22 = smov 128   ;;  %s771_s23 = smov 8  }
  0x12   :  { %22 = dma.hbm_to_vmem [thread:$0]  %s871_s0, 2048, %s17_s13, [#allocation3], %s770_s22, %s770_s22, %s771_s23  }
  0x13   :  { %s772_s26 = smov [#allocation5]   ;;  %s719_s30 = scalar_lea.hbm %s872_s1, 4096 }
  0x14   :  { %s28_s27 = sshll.u32 %s772_s26, 4  ;;  %p720_p8 = scmp.ne.s32.totalorder %s872_s1, %s719_s30  ;;  %s29_s27 = int_to_ptr.vmem [resolvable:$true] %s28_s27 }
  0x15   :  { %p723_p9 = scmp.lt.u32.totalorder %s719_s30, %s872_s1 }
  0x17   :  { %p725_p10 = pnand %p723_p9, %p720_p8 }
  0x19   :  { %728 = shalt.err (!%p725_p10)
}
  0x1a   :  { %s729_s8 = scalar_lea.vmem %s29_s27, 4096  ;;  %p734_p12 = scmp.lt.s32.totalorder %s29_s27, %s29_s27 }
  0x1b   :  { %p730_p11 = scmp.ne.s32.totalorder %s29_s27, %s729_s8  ;;  %p735_p13 = scmp.lt.s32.totalorder %s729_s8, %s729_s8 }
  0x1d   :  { %p736_p0 = por %p735_p13, %p734_p12 }
  0x1f   :  { %p737_p1 = pnand %p736_p0, %p730_p11 }
  0x21   :  { %740 = shalt.err (!%p737_p1)
}
  0x22   :  { %34 = dma.hbm_to_vmem [thread:$0]  %s872_s1, 4096, %s29_s27, [#allocation6], %s770_s22, %s770_s22, %s771_s23  }
  0x23   :  { %763 = dma.done.wait [#allocation3], 2048  }
  0x24   :  { %764 = vsyncadd [#allocation3], 4294965248 }
  0x25   :  { %765 = dma.done.wait [#allocation6], 4096  }
  0x26   :  { %766 = vsyncadd [#allocation6], 4294963200  ;;  %v625_v0 = vld [vmem:[#allocation5 + $0x4] ss:$8 sps:$4 sm:$0xff]   ;;  %v627_v1 = vld [vmem:[#allocation5] ss:$8 sps:$4 sm:$0xff]   ;;  %v93_v48 = vlaneseq }
  0x27   :  { %343 = vmatprep.subr.bf16.mxu0 %v625_v0  ;;  %586 = vmatprep.subr.bf16.mxu1 %v625_v0  ;;  %v628_v2 = vld [vmem:[#allocation5 + $0x14] ss:$8 sps:$4 sm:$0xff]   ;;  %v630_v3 = vld [vmem:[#allocation5 + $0x10] ss:$8 sps:$4 sm:$0xff]   ;;  %v631_v4 = vld [vmem:[#allocation5 + $0x24] ss:$8 sps:$4 sm:$0xff]  }
  0x28   :  { %344 = vmatpush1.bf16.msra.mxu0 %v627_v1  ;;  %602 = vmatpush1.bf16.msra.mxu1 %v627_v1  ;;  %v633_v5 = vld [vmem:[#allocation5 + $0x20] ss:$8 sps:$4 sm:$0xff]   ;;  %v634_v6 = vld [vmem:[#allocation5 + $0x34] ss:$8 sps:$4 sm:$0xff]   ;;  %v636_v7 = vld [vmem:[#allocation5 + $0x30] ss:$8 sps:$4 sm:$0xff]  }
  0x29   :  { %345 = vmatprep.subr.bf16.mxu0 %v628_v2  ;;  %587 = vmatprep.subr.bf16.mxu1 %v628_v2  ;;  %v637_v8 = vld [vmem:[#allocation5 + $0x44] ss:$8 sps:$4 sm:$0xff]   ;;  %v639_v9 = vld [vmem:[#allocation5 + $0x40] ss:$8 sps:$4 sm:$0xff]   ;;  %v640_v10 = vld [vmem:[#allocation5 + $0x54] ss:$8 sps:$4 sm:$0xff]  }
  0x2a   :  { %v642_v11 = vld [vmem:[#allocation5 + $0x50] ss:$8 sps:$4 sm:$0xff]   ;;  %v643_v12 = vld [vmem:[#allocation5 + $0x64] ss:$8 sps:$4 sm:$0xff]   ;;  %v645_v14 = vld [vmem:[#allocation5 + $0x60] ss:$8 sps:$4 sm:$0xff]  }
  0x2b   :  { %v675_v13 = vld [vmem:[#allocation2 + $0x4] ss:$8 sps:$4 sm:$0xff]   ;;  %v646_v16 = vld [vmem:[#allocation5 + $0x74] ss:$8 sps:$4 sm:$0xff]   ;;  %v648_v17 = vld [vmem:[#allocation5 + $0x70] ss:$8 sps:$4 sm:$0xff]  }
  0x2c   :  { %346 = vmatpush1.bf16.msra.mxu0 %v630_v3  ;;  %603 = vmatpush1.bf16.msra.mxu1 %v630_v3  ;;  %v678_v15 = vld [vmem:[#allocation2 + $0x44] ss:$8 sps:$4 sm:$0xff]   ;;  %v651_v19 = vld [vmem:[#allocation5 + $0x80] ss:$8 sps:$4 sm:$0xff]   ;;  %v652_v20 = vld [vmem:[#allocation5 + $0x94] ss:$8 sps:$4 sm:$0xff]  }
  0x2d   :  { %347 = vmatprep.subr.bf16.mxu0 %v631_v4  ;;  %588 = vmatprep.subr.bf16.mxu1 %v631_v4  ;;  %v649_v18 = vld [vmem:[#allocation5 + $0x84] ss:$8 sps:$4 sm:$0xff]   ;;  %v654_v21 = vld [vmem:[#allocation5 + $0x90] ss:$8 sps:$4 sm:$0xff]   ;;  %v657_v23 = vld [vmem:[#allocation5 + $0xa0] ss:$8 sps:$4 sm:$0xff]  }
  0x2e   :  { %375 = vmatprep.mubr.bf16.mxu0 %v675_v13  ;;  %415 = vmatprep.mubr.bf16.mxu1 %v678_v15  ;;  %v655_v22 = vld [vmem:[#allocation5 + $0xa4] ss:$8 sps:$4 sm:$0xff]   ;;  %v658_v24 = vld [vmem:[#allocation5 + $0xb4] ss:$8 sps:$4 sm:$0xff]   ;;  %v660_v25 = vld [vmem:[#allocation5 + $0xb0] ss:$8 sps:$4 sm:$0xff]  }
  0x2f   :  { %v661_v26 = vld [vmem:[#allocation5 + $0xc4] ss:$8 sps:$4 sm:$0xff]   ;;  %v663_v27 = vld [vmem:[#allocation5 + $0xc0] ss:$8 sps:$4 sm:$0xff]   ;;  %v664_v28 = vld [vmem:[#allocation5 + $0xd4] ss:$8 sps:$4 sm:$0xff]  }
  0x30   :  { %348 = vmatpush1.bf16.msra.mxu0 %v633_v5  ;;  %604 = vmatpush1.bf16.msra.mxu1 %v633_v5  ;;  %v666_v29 = vld [vmem:[#allocation5 + $0xd0] ss:$8 sps:$4 sm:$0xff]   ;;  %v667_v30 = vld [vmem:[#allocation5 + $0xe4] ss:$8 sps:$4 sm:$0xff]   ;;  %v669_v31 = vld [vmem:[#allocation5 + $0xe0] ss:$8 sps:$4 sm:$0xff]  }
  0x31   :  { %349 = vmatprep.subr.bf16.mxu0 %v634_v6  ;;  %589 = vmatprep.subr.bf16.mxu1 %v634_v6  ;;  %v670_v32 = vld [vmem:[#allocation5 + $0xf4] ss:$8 sps:$4 sm:$0xff]   ;;  %v672_v33 = vld [vmem:[#allocation5 + $0xf0] ss:$8 sps:$4 sm:$0xff]   ;;  %v673_v34 = vld [vmem:[#allocation2] ss:$8 sps:$4 sm:$0xff]  }
  0x32   :  { %v676_v35 = vld [vmem:[#allocation2 + $0x40] ss:$8 sps:$4 sm:$0xff]   ;;  %v679_v36 = vld [vmem:[#allocation2 + $0x14] ss:$8 sps:$4 sm:$0xff]   ;;  %v683_v38 = vld [vmem:[#allocation2 + $0x10] ss:$8 sps:$4 sm:$0xff]  }
  0x33   :  { %v681_v37 = vld [vmem:[#allocation2 + $0x54] ss:$8 sps:$4 sm:$0xff]   ;;  %v684_v39 = vld [vmem:[#allocation2 + $0x50] ss:$8 sps:$4 sm:$0xff]   ;;  %v685_v40 = vld [vmem:[#allocation2 + $0x24] ss:$8 sps:$4 sm:$0xff]  }
  0x34   :  { %350 = vmatpush1.bf16.msra.mxu0 %v636_v7  ;;  %605 = vmatpush1.bf16.msra.mxu1 %v636_v7  ;;  %v687_v41 = vld [vmem:[#allocation2 + $0x64] ss:$8 sps:$4 sm:$0xff]   ;;  %v689_v42 = vld [vmem:[#allocation2 + $0x20] ss:$8 sps:$4 sm:$0xff]   ;;  %v691_v44 = vld [vmem:[#allocation2 + $0x34] ss:$8 sps:$4 sm:$0xff]  }
  0x35   :  { %351 = vmatprep.subr.bf16.mxu0 %v637_v8  ;;  %590 = vmatprep.subr.bf16.mxu1 %v637_v8  ;;  %v690_v43 = vld [vmem:[#allocation2 + $0x60] ss:$8 sps:$4 sm:$0xff]   ;;  %v693_v45 = vld [vmem:[#allocation2 + $0x74] ss:$8 sps:$4 sm:$0xff]   ;;  %v695_v46 = vld [vmem:[#allocation2 + $0x30] ss:$8 sps:$4 sm:$0xff]  }
  0x36   :  { %v696_v47 = vld [vmem:[#allocation2 + $0x70] ss:$8 sps:$4 sm:$0xff]   ;;  %v94_v49 = vshrl.u32 %v93_v48, 7  ;;  %v91_v51 = vld [vmem:[%s873_s2] sm:$0x3]  ;;  %s773_s2 = smov [#allocation7]  }
  0x37   :  { %s525_s11 = sshll.u32 %s773_s2, 4  ;;  %s526_s11 = int_to_ptr.vmem [resolvable:$true] %s525_s11 }
  0x38   :  { %352 = vmatpush1.bf16.msra.mxu0 %v639_v9  ;;  %606 = vmatpush1.bf16.msra.mxu1 %v639_v9  ;;  %v95_v50 = vsub.s32 0, %v94_v49  ;;  %v99_v52 = vsub.s32 1, %v94_v49  ;;  %s741_s12 = scalar_lea.vmem %s526_s11, 4096  ;;  %p746_p3 = scmp.lt.s32.totalorder %s526_s11, %s526_s11 }
  0x39   :  { %353 = vmatprep.subr.bf16.mxu0 %v640_v10  ;;  %591 = vmatprep.subr.bf16.mxu1 %v640_v10  ;;  %p742_p2 = scmp.ne.s32.totalorder %s526_s11, %s741_s12  ;;  %p747_p4 = scmp.lt.s32.totalorder %s741_s12, %s741_s12 }
  0x3a   :  { %v823_v53 = vrot.slane %v91_v51, %v95_v50  ;;  %v825_v54 = vrot.slane %v91_v51, %v99_v52 }
  0x3b   :  { %p748_p5 = por %p747_p4, %p746_p3 }
  0x3c   :  { %354 = vmatpush1.bf16.msra.mxu0 %v642_v11  ;;  %607 = vmatpush1.bf16.msra.mxu1 %v642_v11 }
  0x3d   :  { %355 = vmatprep.subr.bf16.mxu0 %v643_v12  ;;  %592 = vmatprep.subr.bf16.mxu1 %v643_v12  ;;  %p749_p6 = pnand %p748_p5, %p742_p2 }
  0x40   :  { %356 = vmatpush1.bf16.msra.mxu0 %v645_v14  ;;  %608 = vmatpush1.bf16.msra.mxu1 %v645_v14 }
  0x41   :  { %357 = vmatprep.subr.bf16.mxu0 %v646_v16  ;;  %593 = vmatprep.subr.bf16.mxu1 %v646_v16 }
  0x44   :  { %358 = vmatpush1.bf16.msra.mxu0 %v648_v17  ;;  %609 = vmatpush1.bf16.msra.mxu1 %v648_v17 }
  0x45   :  { %359 = vmatprep.subr.bf16.mxu0 %v649_v18  ;;  %594 = vmatprep.subr.bf16.mxu1 %v649_v18 }
  0x48   :  { %360 = vmatpush1.bf16.msra.mxu0 %v651_v19  ;;  %610 = vmatpush1.bf16.msra.mxu1 %v651_v19 }
  0x49   :  { %361 = vmatprep.subr.bf16.mxu0 %v652_v20  ;;  %595 = vmatprep.subr.bf16.mxu1 %v652_v20 }
  0x4c   :  { %362 = vmatpush1.bf16.msra.mxu0 %v654_v21  ;;  %611 = vmatpush1.bf16.msra.mxu1 %v654_v21 }
  0x4d   :  { %363 = vmatprep.subr.bf16.mxu0 %v655_v22  ;;  %596 = vmatprep.subr.bf16.mxu1 %v655_v22 }
  0x50   :  { %364 = vmatpush1.bf16.msra.mxu0 %v657_v23  ;;  %612 = vmatpush1.bf16.msra.mxu1 %v657_v23 }
  0x51   :  { %365 = vmatprep.subr.bf16.mxu0 %v658_v24  ;;  %597 = vmatprep.subr.bf16.mxu1 %v658_v24 }
  0x54   :  { %366 = vmatpush1.bf16.msra.mxu0 %v660_v25  ;;  %613 = vmatpush1.bf16.msra.mxu1 %v660_v25 }
  0x55   :  { %367 = vmatprep.subr.bf16.mxu0 %v661_v26  ;;  %598 = vmatprep.subr.bf16.mxu1 %v661_v26 }
  0x58   :  { %368 = vmatpush1.bf16.msra.mxu0 %v663_v27  ;;  %614 = vmatpush1.bf16.msra.mxu1 %v663_v27 }
  0x59   :  { %369 = vmatprep.subr.bf16.mxu0 %v664_v28  ;;  %599 = vmatprep.subr.bf16.mxu1 %v664_v28 }
  0x5c   :  { %370 = vmatpush1.bf16.msra.mxu0 %v666_v29  ;;  %615 = vmatpush1.bf16.msra.mxu1 %v666_v29 }
  0x5d   :  { %371 = vmatprep.subr.bf16.mxu0 %v667_v30  ;;  %600 = vmatprep.subr.bf16.mxu1 %v667_v30 }
  0x60   :  { %372 = vmatpush1.bf16.msra.mxu0 %v669_v31  ;;  %616 = vmatpush1.bf16.msra.mxu1 %v669_v31 }
  0x61   :  { %373 = vmatprep.subr.bf16.mxu0 %v670_v32  ;;  %601 = vmatprep.subr.bf16.mxu1 %v670_v32 }
  0x64   :  { %374 = vmatpush1.bf16.msra.mxu0 %v672_v33  ;;  %617 = vmatpush1.bf16.msra.mxu1 %v672_v33 }
  0x67   :  { %376 = vmatmul.mubr.bf16.vlgmr.msra.gmra.mrb[0].mxu0 %v673_v34  ;;  %416 = vmatmul.mubr.bf16.vlgmr.msra.gmra.mrb[0].mxu1 %v676_v35 }
  0x68   :  { %385 = vmatprep.mubr.bf16.mxu0 %v679_v36  ;;  %425 = vmatprep.mubr.bf16.mxu1 %v681_v37 }
  0x6f   :  { %386 = vmatmul.mubr.bf16.gmra.mrb[4].mxu0 %v683_v38  ;;  %426 = vmatmul.mubr.bf16.gmra.mrb[4].mxu1 %v684_v39 }
  0x70   :  { %395 = vmatprep.mubr.bf16.mxu0 %v685_v40  ;;  %435 = vmatprep.mubr.bf16.mxu1 %v687_v41 }
  0x77   :  { %396 = vmatmul.mubr.bf16.gmra.mrb[8].mxu0 %v689_v42  ;;  %436 = vmatmul.mubr.bf16.gmra.mrb[8].mxu1 %v690_v43 }
  0x78   :  { %405 = vmatprep.mubr.bf16.mxu0 %v691_v44  ;;  %445 = vmatprep.mubr.bf16.mxu1 %v693_v45 }
  0x7f   :  { %406 = vmatmul.mubr.bf16.gmra.mrb[12].mxu0 %v695_v46  ;;  %446 = vmatmul.mubr.bf16.gmra.mrb[12].mxu1 %v696_v47 }
 0x13a   :  { %v377_v55 = vpop.f32.mrb[0].mxu0  ;;  %v417_v56 = vpop.f32.mrb[0].mxu1 }
 0x13b   :  { %v378_v57 = vadd.f32 %v377_v55, %v823_v53  ;;  %v418_v58 = vadd.f32 %v417_v56, %v823_v53  ;;  %v379_v59 = vpop.f32.mrb[1].mxu0  ;;  %v419_v60 = vpop.f32.mrb[1].mxu1 }
 0x13c   :  { %v380_v61 = vadd.f32 %v379_v59, %v825_v54  ;;  %v420_v62 = vadd.f32 %v419_v60, %v825_v54  ;;  %v381_v63 = vpop.f32.mrb[2].mxu0  ;;  %v421_v0 = vpop.f32.mrb[2].mxu1 }
 0x13d   :  { %v456_v1 = vmax.f32 %v378_v57, 0.0  ;;  %v472_v2 = vmax.f32 %v418_v58, 0.0  ;;  %v382_v3 = vadd.f32 %v381_v63, %v823_v53  ;;  %v422_v4 = vadd.f32 %v421_v0, %v823_v53  ;;  %v383_v5 = vpop.f32.mrb[3].mxu0  ;;  %v423_v6 = vpop.f32.mrb[3].mxu1 }
 0x13e   :  { %v457_v7 = vmax.f32 %v380_v61, 0.0  ;;  %v473_v8 = vmax.f32 %v420_v62, 0.0  ;;  %v384_v9 = vadd.f32 %v383_v5, %v825_v54  ;;  %v424_v10 = vadd.f32 %v423_v6, %v825_v54 }
 0x13f   :  { %488 = vst [vmem:[#allocation7] sm:$0xff] %v456_v1  ;;  %504 = vst [vmem:[#allocation7 + $0x80] sm:$0xff] %v472_v2  ;;  %v458_v11 = vmax.f32 %v382_v3, 0.0  ;;  %v474_v12 = vmax.f32 %v422_v4, 0.0 }
 0x140   :  { %489 = vst [vmem:[#allocation7 + $0x8] sm:$0xff] %v457_v7  ;;  %505 = vst [vmem:[#allocation7 + $0x88] sm:$0xff] %v473_v8  ;;  %v459_v13 = vmax.f32 %v384_v9, 0.0  ;;  %v475_v14 = vmax.f32 %v424_v10, 0.0 }
 0x141   :  { %490 = vst [vmem:[#allocation7 + $0x10] sm:$0xff] %v458_v11  ;;  %506 = vst [vmem:[#allocation7 + $0x90] sm:$0xff] %v474_v12 }
 0x142   :  { %491 = vst [vmem:[#allocation7 + $0x18] sm:$0xff] %v459_v13  ;;  %507 = vst [vmem:[#allocation7 + $0x98] sm:$0xff] %v475_v14  ;;  %v387_v15 = vpop.f32.mrb[4].mxu0  ;;  %v427_v16 = vpop.f32.mrb[4].mxu1 }
 0x143   :  { %v388_v17 = vadd.f32 %v387_v15, %v823_v53  ;;  %v428_v18 = vadd.f32 %v427_v16, %v823_v53  ;;  %v389_v19 = vpop.f32.mrb[5].mxu0  ;;  %v429_v20 = vpop.f32.mrb[5].mxu1 }
 0x144   :  { %v390_v21 = vadd.f32 %v389_v19, %v825_v54  ;;  %v430_v22 = vadd.f32 %v429_v20, %v825_v54  ;;  %v391_v23 = vpop.f32.mrb[6].mxu0  ;;  %v431_v24 = vpop.f32.mrb[6].mxu1 }
 0x145   :  { %v460_v25 = vmax.f32 %v388_v17, 0.0  ;;  %v476_v26 = vmax.f32 %v428_v18, 0.0  ;;  %v392_v27 = vadd.f32 %v391_v23, %v823_v53  ;;  %v432_v28 = vadd.f32 %v431_v24, %v823_v53  ;;  %v393_v29 = vpop.f32.mrb[7].mxu0  ;;  %v433_v30 = vpop.f32.mrb[7].mxu1 }
 0x146   :  { %v461_v31 = vmax.f32 %v390_v21, 0.0  ;;  %v477_v32 = vmax.f32 %v430_v22, 0.0  ;;  %v394_v33 = vadd.f32 %v393_v29, %v825_v54  ;;  %v434_v34 = vadd.f32 %v433_v30, %v825_v54 }
 0x147   :  { %492 = vst [vmem:[#allocation7 + $0x20] sm:$0xff] %v460_v25  ;;  %508 = vst [vmem:[#allocation7 + $0xa0] sm:$0xff] %v476_v26  ;;  %v462_v35 = vmax.f32 %v392_v27, 0.0  ;;  %v478_v36 = vmax.f32 %v432_v28, 0.0 }
 0x148   :  { %493 = vst [vmem:[#allocation7 + $0x28] sm:$0xff] %v461_v31  ;;  %509 = vst [vmem:[#allocation7 + $0xa8] sm:$0xff] %v477_v32  ;;  %v463_v37 = vmax.f32 %v394_v33, 0.0  ;;  %v479_v38 = vmax.f32 %v434_v34, 0.0 }
 0x149   :  { %494 = vst [vmem:[#allocation7 + $0x30] sm:$0xff] %v462_v35  ;;  %510 = vst [vmem:[#allocation7 + $0xb0] sm:$0xff] %v478_v36 }
 0x14a   :  { %495 = vst [vmem:[#allocation7 + $0x38] sm:$0xff] %v463_v37  ;;  %511 = vst [vmem:[#allocation7 + $0xb8] sm:$0xff] %v479_v38  ;;  %v397_v39 = vpop.f32.mrb[8].mxu0  ;;  %v437_v40 = vpop.f32.mrb[8].mxu1 }
 0x14b   :  { %v398_v41 = vadd.f32 %v397_v39, %v823_v53  ;;  %v438_v42 = vadd.f32 %v437_v40, %v823_v53  ;;  %v399_v43 = vpop.f32.mrb[9].mxu0  ;;  %v439_v44 = vpop.f32.mrb[9].mxu1 }
 0x14c   :  { %v400_v45 = vadd.f32 %v399_v43, %v825_v54  ;;  %v440_v46 = vadd.f32 %v439_v44, %v825_v54  ;;  %v401_v47 = vpop.f32.mrb[10].mxu0  ;;  %v441_v48 = vpop.f32.mrb[10].mxu1 }
 0x14d   :  { %v464_v49 = vmax.f32 %v398_v41, 0.0  ;;  %v480_v50 = vmax.f32 %v438_v42, 0.0  ;;  %v402_v51 = vadd.f32 %v401_v47, %v823_v53  ;;  %v442_v52 = vadd.f32 %v441_v48, %v823_v53  ;;  %v403_v55 = vpop.f32.mrb[11].mxu0  ;;  %v443_v56 = vpop.f32.mrb[11].mxu1 }
 0x14e   :  { %v465_v57 = vmax.f32 %v400_v45, 0.0  ;;  %v481_v58 = vmax.f32 %v440_v46, 0.0  ;;  %v404_v59 = vadd.f32 %v403_v55, %v825_v54  ;;  %v444_v60 = vadd.f32 %v443_v56, %v825_v54 }
 0x14f   :  { %496 = vst [vmem:[#allocation7 + $0x40] sm:$0xff] %v464_v49  ;;  %512 = vst [vmem:[#allocation7 + $0xc0] sm:$0xff] %v480_v50  ;;  %v466_v61 = vmax.f32 %v402_v51, 0.0  ;;  %v482_v62 = vmax.f32 %v442_v52, 0.0 }
 0x150   :  { %497 = vst [vmem:[#allocation7 + $0x48] sm:$0xff] %v465_v57  ;;  %513 = vst [vmem:[#allocation7 + $0xc8] sm:$0xff] %v481_v58  ;;  %v467_v63 = vmax.f32 %v404_v59, 0.0  ;;  %v483_v0 = vmax.f32 %v444_v60, 0.0 }
 0x151   :  { %498 = vst [vmem:[#allocation7 + $0x50] sm:$0xff] %v466_v61  ;;  %514 = vst [vmem:[#allocation7 + $0xd0] sm:$0xff] %v482_v62 }
 0x152   :  { %499 = vst [vmem:[#allocation7 + $0x58] sm:$0xff] %v467_v63  ;;  %515 = vst [vmem:[#allocation7 + $0xd8] sm:$0xff] %v483_v0  ;;  %v407_v1 = vpop.f32.mrb[12].mxu0  ;;  %v447_v2 = vpop.f32.mrb[12].mxu1 }
 0x153   :  { %v408_v3 = vadd.f32 %v407_v1, %v823_v53  ;;  %v448_v4 = vadd.f32 %v447_v2, %v823_v53  ;;  %v409_v5 = vpop.f32.mrb[13].mxu0  ;;  %v449_v6 = vpop.f32.mrb[13].mxu1 }
 0x154   :  { %v410_v7 = vadd.f32 %v409_v5, %v825_v54  ;;  %v450_v8 = vadd.f32 %v449_v6, %v825_v54  ;;  %v411_v9 = vpop.f32.mrb[14].mxu0  ;;  %v451_v10 = vpop.f32.mrb[14].mxu1 }
 0x155   :  { %v468_v11 = vmax.f32 %v408_v3, 0.0  ;;  %v484_v12 = vmax.f32 %v448_v4, 0.0  ;;  %v412_v13 = vadd.f32 %v411_v9, %v823_v53  ;;  %v452_v14 = vadd.f32 %v451_v10, %v823_v53  ;;  %v413_v15 = vpop.f32.mrb[15].mxu0  ;;  %v453_v16 = vpop.f32.mrb[15].mxu1 }
 0x156   :  { %v469_v17 = vmax.f32 %v410_v7, 0.0  ;;  %v485_v18 = vmax.f32 %v450_v8, 0.0  ;;  %v414_v19 = vadd.f32 %v413_v15, %v825_v54  ;;  %v454_v20 = vadd.f32 %v453_v16, %v825_v54 }
 0x157   :  { %500 = vst [vmem:[#allocation7 + $0x60] sm:$0xff] %v468_v11  ;;  %516 = vst [vmem:[#allocation7 + $0xe0] sm:$0xff] %v484_v12  ;;  %v470_v21 = vmax.f32 %v412_v13, 0.0  ;;  %v486_v22 = vmax.f32 %v452_v14, 0.0 }
 0x158   :  { %501 = vst [vmem:[#allocation7 + $0x68] sm:$0xff] %v469_v17  ;;  %517 = vst [vmem:[#allocation7 + $0xe8] sm:$0xff] %v485_v18  ;;  %v471_v23 = vmax.f32 %v414_v19, 0.0  ;;  %v487_v24 = vmax.f32 %v454_v20, 0.0 }
 0x159   :  { %502 = vst [vmem:[#allocation7 + $0x70] sm:$0xff] %v470_v21  ;;  %518 = vst [vmem:[#allocation7 + $0xf0] sm:$0xff] %v486_v22 }
 0x15a   :  { %503 = vst [vmem:[#allocation7 + $0x78] sm:$0xff] %v471_v23  ;;  %519 = vst [vmem:[#allocation7 + $0xf8] sm:$0xff] %v487_v24 }
 0x15b   :  { %752 = shalt.err (!%p749_p6)
}
 0x15c   :  { %s753_s15 = scalar_lea.hbm %s874_s3, 4096 }
 0x15d   :  { %p754_p7 = scmp.ne.s32.totalorder %s874_s3, %s753_s15  ;;  %p757_p8 = scmp.lt.u32.totalorder %s753_s15, %s874_s3 }
 0x15f   :  { %p759_p9 = pnand %p757_p8, %p754_p7 }
 0x161   :  { %762 = shalt.err (!%p759_p9)
}
 0x162   :  { %s774_s20 = smov 256   ;;  %s775_s21 = smov 16  }
 0x163   :  { %531 = dma.vmem_to_hbm [thread:$0]  %s526_s11, 4096, %s874_s3, [#allocation4], %s774_s20, %s774_s20, %s775_s21  }
 0x164   :  { %767 = dma.done.wait [#allocation4], 4096  }
 0x165   :  { %768 = vsyncadd [#allocation4], 4294963200 }
 0x166   :  { %535 = vsyncpa [#allocation3], 1 }
 0x167   :  { %536 = vsyncpa [#allocation6], 1 }
 0x168   :  { %537 = vsyncpa [#allocation4], 1 }

</bundles_post_ra>
